<compile_context>
chip_gen: v6e
topology: v6e:2x2x1
jax: 0.10.0
libtpu: 0.0.40
codegen_flags: <defaults>
</compile_context>

<pallas_src>
import functools

import jax
import jax.numpy as jnp
from jax import lax
from jax.experimental import pallas as pl
from jax.experimental.pallas import tpu as pltpu

_BN_EPS = 1e-5


def _smooth_kernel(x_ref, w1_ref, b1_ref, w2_ref, b2_ref, o_ref, *, H, W):
    Nb = x_ref.shape[0]          # images handled by this grid step
    HW = H * W
    NHW = Nb * HW

    # Per-lane position helpers (computed once per invocation).
    hw = lax.broadcasted_iota(jnp.int32, (1, NHW), 1) % HW   # flat pos in image
    col = hw % W                                             # column within row
    row_ok = {-1: hw >= W, 0: None, 1: hw < HW - W}          # 0 <= i+di < H
    col_ok = {-1: col >= 1, 0: None, 1: col <= W - 2}        # 0 <= j+dj < W

    def conv_bn_relu(x, wf, bf):
        """x: (C, NHW) activations with batch folded into lanes.
        wf: (Cout_p, 9*C) folded weights (column = tap*C + c), bf: (Cout_p, 1)."""
        chunks = []
        for di in (-1, 0, 1):
            for dj in (-1, 0, 1):
                if di == 0 and dj == 0:
                    chunks.append(x)                         # centre tap: as-is
                    continue
                s = di * W + dj
                # shifted[:, g] == x[:, g + s] (circular; wrap is masked below)
                shifted = pltpu.roll(x, shift=(-s) % NHW, axis=1)
                rm, cm = row_ok[di], col_ok[dj]
                mask = cm if rm is None else (rm if cm is None else rm & cm)
                chunks.append(jnp.where(mask, shifted, 0.0))
        patches = jnp.concatenate(chunks, axis=0)            # (9*C, NHW)
        acc = jnp.dot(wf, patches, preferred_element_type=jnp.float32) + bf
        return jnp.maximum(acc, 0.0)                         # (Cout_p, NHW)

    # Fold the batch into the lane axis: (Cin_p, Nb*HW); lane-aligned concat.
    if Nb > 1:
        x = jnp.concatenate([x_ref[n] for n in range(Nb)], axis=1)
    else:
        x = x_ref[0]

    h = conv_bn_relu(x, w1_ref[...], b1_ref[...])
    h = conv_bn_relu(h, w2_ref[...], b2_ref[...])

    for n in range(Nb):                                      # lane-aligned stores
        o_ref[n] = h[:, n * HW:(n + 1) * HW]


def smooth_forward(x_nchw, params, *, out_channels, num_blocks=1):
    """Forward of `smooth`: (Conv3x3 + BN + ReLU) x 2.  x_nchw: (N,Cin,H,W) f32."""
    N, Cin, H, W = x_nchw.shape
    w1f, b1f = params["w1f"], params["b1f"]
    w2f, b2f = params["w2f"], params["b2f"]
    Cout_p = w1f.shape[0]
    Cin_p = w1f.shape[1] // 9
    HW = H * W

    if Cin_p != Cin:  # pad input channels to the weight's padded Cin (static)
        x_nchw = jnp.pad(x_nchw, ((0, 0), (0, Cin_p - Cin), (0, 0), (0, 0)))
    x_flat = x_nchw.reshape(N, Cin_p, HW)                    # contiguous -> free

    G = num_blocks                  # 1 for v5e/v6e; 2 to split across v7x cores
    assert N % G == 0, (N, G)
    Nb = N // G

    out = pl.pallas_call(
        functools.partial(_smooth_kernel, H=H, W=W),
        out_shape=jax.ShapeDtypeStruct((N, Cout_p, HW), jnp.float32),
        grid=(G,),
        in_specs=[
            pl.BlockSpec((Nb, Cin_p, HW), lambda g: (g, 0, 0)),
            pl.BlockSpec((Cout_p, 9 * Cin_p), lambda g: (0, 0)),
            pl.BlockSpec((Cout_p, 1), lambda g: (0, 0)),
            pl.BlockSpec((Cout_p, 9 * Cout_p), lambda g: (0, 0)),
            pl.BlockSpec((Cout_p, 1), lambda g: (0, 0)),
        ],
        out_specs=pl.BlockSpec((Nb, Cout_p, HW), lambda g: (g, 0, 0)),
        compiler_params=pltpu.CompilerParams(
            dimension_semantics=("parallel",)),
    )(x_flat, w1f, b1f, w2f, b2f)

    return out[:, :out_channels].reshape(N, out_channels, H, W)


def _round_up(v, m):
    return (v + m - 1) // m * m


def prepare_params(raw):
    """One-time prep: fold eval-mode BN into the convs, pad Cout (and Cin) to the
    8-row f32 sublane tile with zeros, and re-layout weights to (Cout_p, 9*Cin_p)
    matching the kernel's im2col tap ordering (column = tap*Cin_p + c)."""
    def fold(w, b, gamma, beta, mean, var):
        scale = gamma / jnp.sqrt(var + _BN_EPS)              # (Cout,)
        return w * scale[:, None, None, None], (b - mean) * scale + beta

    w1, b1 = fold(raw["c1_w"], raw["c1_b"], raw["bn1_g"], raw["bn1_b"],
                  raw["bn1_m"], raw["bn1_v"])
    w2, b2 = fold(raw["c2_w"], raw["c2_b"], raw["bn2_g"], raw["bn2_b"],
                  raw["bn2_m"], raw["bn2_v"])
    Cout, Cin = w1.shape[0], w1.shape[1]
    Cin_p = _round_up(Cin, 8)
    Cout_p = _round_up(Cout, 8)

    def pad_oihw(w, co_p, ci_p):       # zero rows/cols so padded channels stay 0
        return jnp.zeros((co_p, ci_p, 3, 3), jnp.float32).at[
            :w.shape[0], :w.shape[1]].set(w)

    def pad_bias(b, co_p):
        return jnp.zeros((co_p,), jnp.float32).at[:b.shape[0]].set(b)

    def relayout(w):                    # (Co,Ci,3,3) -> (Co, 9*Ci)
        return jnp.transpose(w, (0, 2, 3, 1)).reshape(w.shape[0], -1)

    w1p = pad_oihw(w1, Cout_p, Cin_p)
    w2p = pad_oihw(w2, Cout_p, Cout_p)
    return {
        "w1f": relayout(w1p), "b1f": pad_bias(b1, Cout_p)[:, None],
        "w2f": relayout(w2p), "b2f": pad_bias(b2, Cout_p)[:, None],
    }


# ----------------------------------------------------------------------------
# Pure-JAX reference (for correctness check)
# ----------------------------------------------------------------------------
def _ref_forward(x, raw):
    def block(x, w, b, g, beta, m, v):
        o = lax.conv_general_dilated(
            x, w, window_strides=(1, 1), padding="SAME",
            dimension_numbers=("NCHW", "OIHW", "NCHW"))
        o = o + b[None, :, None, None]
        o = (o - m[None, :, None, None]) * (
            g[None, :, None, None] / jnp.sqrt(v[None, :, None, None] + _BN_EPS)
        ) + beta[None, :, None, None]
        return jnp.maximum(o, 0.0)

    h = block(x, raw["c1_w"], raw["c1_b"], raw["bn1_g"], raw["bn1_b"],
              raw["bn1_m"], raw["bn1_v"])
    h = block(h, raw["c2_w"], raw["c2_b"], raw["bn2_g"], raw["bn2_b"],
              raw["bn2_m"], raw["bn2_v"])
    return h


if __name__ == "__main__":
    # Module config: smooth(in_size=8, out_size=4)
    in_size, out_size = 8, 4
    N, H, W = 2, 16, 16
    key = jax.random.PRNGKey(0)
    ks = jax.random.split(key, 16)

    raw = {
        # Conv2d(in_size, out_size, 3, pad=1)
        "c1_w": 0.1 * jax.random.normal(ks[0], (out_size, in_size, 3, 3), jnp.float32),
        "c1_b": 0.1 * jax.random.normal(ks[1], (out_size,), jnp.float32),
        # BatchNorm2d(out_size) — eval-mode params / running stats
        "bn1_g": 1.0 + 0.1 * jax.random.normal(ks[2], (out_size,), jnp.float32),
        "bn1_b": 0.1 * jax.random.normal(ks[3], (out_size,), jnp.float32),
        "bn1_m": 0.1 * jax.random.normal(ks[4], (out_size,), jnp.float32),
        "bn1_v": jax.random.uniform(ks[5], (out_size,), jnp.float32, 0.5, 1.5),
        # Conv2d(out_size, out_size, 3, pad=1)
        "c2_w": 0.1 * jax.random.normal(ks[6], (out_size, out_size, 3, 3), jnp.float32),
        "c2_b": 0.1 * jax.random.normal(ks[7], (out_size,), jnp.float32),
        # BatchNorm2d(out_size)
        "bn2_g": 1.0 + 0.1 * jax.random.normal(ks[8], (out_size,), jnp.float32),
        "bn2_b": 0.1 * jax.random.normal(ks[9], (out_size,), jnp.float32),
        "bn2_m": 0.1 * jax.random.normal(ks[10], (out_size,), jnp.float32),
        "bn2_v": jax.random.uniform(ks[11], (out_size,), jnp.float32, 0.5, 1.5),
    }
    x = jax.random.normal(ks[12], (N, in_size, H, W), jnp.float32)

    params = prepare_params(raw)          # one-time weight folding / re-layout
    fwd = jax.jit(functools.partial(smooth_forward, out_channels=out_size))

    out = jax.block_until_ready(fwd(x, params))
    ref = jax.block_until_ready(_ref_forward(x, raw))

    assert out.shape == (N, out_size, H, W), out.shape
    err = float(jnp.max(jnp.abs(out - ref)))
    assert jnp.allclose(out, ref, rtol=1e-4, atol=1e-4), err
    print("KERNEL_OK")
</pallas_src>

<mosaic_0001>
module attributes {stable_mosaic.version = 11 : i64} {
  func.func @_smooth_kernel(%arg0: i32, %arg1: memref<2x8x256xf32, #tpu.memory_space<vmem>>, %arg2: memref<8x72xf32, #tpu.memory_space<vmem>>, %arg3: memref<8x1xf32, #tpu.memory_space<vmem>>, %arg4: memref<8x72xf32, #tpu.memory_space<vmem>>, %arg5: memref<8x1xf32, #tpu.memory_space<vmem>>, %arg6: memref<2x8x256xf32, #tpu.memory_space<vmem>>) attributes {dimension_semantics = [#tpu.dimension_semantics<parallel>], iteration_bounds = array<i64: 1>, scalar_prefetch = 0 : i64, scratch_operands = 0 : i64, tpu.core_type = #tpu.core_type<tc>, window_params = [{transform_indices = @transform_0, window_bounds = array<i64: 2, 8, 256>}, {pipeline_mode = #tpu.pipeline_mode<synchronous>, transform_indices = @transform_1, window_bounds = array<i64: 8, 72>}, {pipeline_mode = #tpu.pipeline_mode<synchronous>, transform_indices = @transform_2, window_bounds = array<i64: 8, 1>}, {pipeline_mode = #tpu.pipeline_mode<synchronous>, transform_indices = @transform_3, window_bounds = array<i64: 8, 72>}, {pipeline_mode = #tpu.pipeline_mode<synchronous>, transform_indices = @transform_4, window_bounds = array<i64: 8, 1>}, {transform_indices = @transform_5, window_bounds = array<i64: 2, 8, 256>}]} {
    %0 = tpu.iota {dimensions = array<i32: 1>} : vector<1x512xi32>
    %c256_i32 = arith.constant 256 : i32
    %c0_i32 = arith.constant 0 : i32
    %1 = arith.cmpi eq, %c256_i32, %c0_i32 : i32
    %c1_i32 = arith.constant 1 : i32
    %2 = arith.select %1, %c1_i32, %c256_i32 : i32
    %3 = vector.broadcast %2 : i32 to vector<1x512xi32>
    %4 = arith.remsi %0, %3 : vector<1x512xi32>
    %c0_i32_0 = arith.constant 0 : i32
    %5 = vector.broadcast %c0_i32_0 : i32 to vector<1x512xi32>
    %6 = arith.cmpi ne, %4, %5 : vector<1x512xi32>
    %c0_i32_1 = arith.constant 0 : i32
    %7 = vector.broadcast %c0_i32_1 : i32 to vector<1x512xi32>
    %8 = arith.cmpi slt, %4, %7 : vector<1x512xi32>
    %c0_i32_2 = arith.constant 0 : i32
    %9 = arith.cmpi slt, %2, %c0_i32_2 : i32
    %10 = vector.broadcast %9 : i1 to vector<1x512xi1>
    %11 = vector.broadcast %10 : vector<1x512xi1> to vector<1x512xi1>
    %12 = arith.xori %8, %11 : vector<1x512xi1>
    %13 = arith.andi %12, %6 : vector<1x512xi1>
    %14 = vector.broadcast %2 : i32 to vector<1x512xi32>
    %15 = arith.addi %4, %14 : vector<1x512xi32>
    %16 = arith.select %13, %15, %4 : vector<1x512xi1>, vector<1x512xi32>
    %c16_i32 = arith.constant 16 : i32
    %c0_i32_3 = arith.constant 0 : i32
    %17 = arith.cmpi eq, %c16_i32, %c0_i32_3 : i32
    %c1_i32_4 = arith.constant 1 : i32
    %18 = arith.select %17, %c1_i32_4, %c16_i32 : i32
    %19 = vector.broadcast %18 : i32 to vector<1x512xi32>
    %20 = arith.remsi %16, %19 : vector<1x512xi32>
    %c0_i32_5 = arith.constant 0 : i32
    %21 = vector.broadcast %c0_i32_5 : i32 to vector<1x512xi32>
    %22 = arith.cmpi ne, %20, %21 : vector<1x512xi32>
    %c0_i32_6 = arith.constant 0 : i32
    %23 = vector.broadcast %c0_i32_6 : i32 to vector<1x512xi32>
    %24 = arith.cmpi slt, %20, %23 : vector<1x512xi32>
    %c0_i32_7 = arith.constant 0 : i32
    %25 = arith.cmpi slt, %18, %c0_i32_7 : i32
    %26 = vector.broadcast %25 : i1 to vector<1x512xi1>
    %27 = vector.broadcast %26 : vector<1x512xi1> to vector<1x512xi1>
    %28 = arith.xori %24, %27 : vector<1x512xi1>
    %29 = arith.andi %28, %22 : vector<1x512xi1>
    %30 = vector.broadcast %18 : i32 to vector<1x512xi32>
    %31 = arith.addi %20, %30 : vector<1x512xi32>
    %32 = arith.select %29, %31, %20 : vector<1x512xi1>, vector<1x512xi32>
    %c16_i32_8 = arith.constant 16 : i32
    %33 = vector.broadcast %c16_i32_8 : i32 to vector<1x512xi32>
    %34 = arith.cmpi sge, %16, %33 : vector<1x512xi32>
    %c240_i32 = arith.constant 240 : i32
    %35 = vector.broadcast %c240_i32 : i32 to vector<1x512xi32>
    %36 = arith.cmpi slt, %16, %35 : vector<1x512xi32>
    %c1_i32_9 = arith.constant 1 : i32
    %37 = vector.broadcast %c1_i32_9 : i32 to vector<1x512xi32>
    %38 = arith.cmpi sge, %32, %37 : vector<1x512xi32>
    %c14_i32 = arith.constant 14 : i32
    %39 = vector.broadcast %c14_i32 : i32 to vector<1x512xi32>
    %40 = arith.cmpi sle, %32, %39 : vector<1x512xi32>
    %c0 = arith.constant 0 : index
    %c0_10 = arith.constant 0 : index
    %c0_11 = arith.constant 0 : index
    %41 = vector.load %arg1[%c0, %c0_10, %c0_11] : memref<2x8x256xf32, #tpu.memory_space<vmem>>, vector<1x8x256xf32>
    %42 = vector.shape_cast %41 : vector<1x8x256xf32> to vector<8x256xf32>
    %c1 = arith.constant 1 : index
    %c0_12 = arith.constant 0 : index
    %c0_13 = arith.constant 0 : index
    %43 = vector.load %arg1[%c1, %c0_12, %c0_13] : memref<2x8x256xf32, #tpu.memory_space<vmem>>, vector<1x8x256xf32>
    %44 = vector.shape_cast %43 : vector<1x8x256xf32> to vector<8x256xf32>
    %45 = tpu.concatenate %42, %44 in 1 : vector<8x256xf32>, vector<8x256xf32> -> vector<8x512xf32>
    %c0_14 = arith.constant 0 : index
    %c0_15 = arith.constant 0 : index
    %46 = vector.load %arg2[%c0_14, %c0_15] : memref<8x72xf32, #tpu.memory_space<vmem>>, vector<8x72xf32>
    %c0_16 = arith.constant 0 : index
    %c0_17 = arith.constant 0 : index
    %47 = vector.load %arg3[%c0_16, %c0_17] : memref<8x1xf32, #tpu.memory_space<vmem>>, vector<8x1xf32>
    %c17_i32 = arith.constant 17 : i32
    %48 = tpu.dynamic_rotate %45 by %c17_i32 dim 1 : vector<8x512xf32>, i32 -> vector<8x512xf32>
    %49 = arith.andi %34, %38 : vector<1x512xi1>
    %cst = arith.constant 0.000000e+00 : f32
    %50 = vector.shape_cast %49 : vector<1x512xi1> to vector<1x512xi1>
    %51 = vector.broadcast %50 : vector<1x512xi1> to vector<8x512xi1>
    %52 = vector.broadcast %cst : f32 to vector<8x512xf32>
    %53 = arith.select %51, %48, %52 : vector<8x512xi1>, vector<8x512xf32>
    %c16_i32_18 = arith.constant 16 : i32
    %54 = tpu.dynamic_rotate %45 by %c16_i32_18 dim 1 : vector<8x512xf32>, i32 -> vector<8x512xf32>
    %cst_19 = arith.constant 0.000000e+00 : f32
    %55 = vector.shape_cast %34 : vector<1x512xi1> to vector<1x512xi1>
    %56 = vector.broadcast %55 : vector<1x512xi1> to vector<8x512xi1>
    %57 = vector.broadcast %cst_19 : f32 to vector<8x512xf32>
    %58 = arith.select %56, %54, %57 : vector<8x512xi1>, vector<8x512xf32>
    %c15_i32 = arith.constant 15 : i32
    %59 = tpu.dynamic_rotate %45 by %c15_i32 dim 1 : vector<8x512xf32>, i32 -> vector<8x512xf32>
    %60 = arith.andi %34, %40 : vector<1x512xi1>
    %cst_20 = arith.constant 0.000000e+00 : f32
    %61 = vector.shape_cast %60 : vector<1x512xi1> to vector<1x512xi1>
    %62 = vector.broadcast %61 : vector<1x512xi1> to vector<8x512xi1>
    %63 = vector.broadcast %cst_20 : f32 to vector<8x512xf32>
    %64 = arith.select %62, %59, %63 : vector<8x512xi1>, vector<8x512xf32>
    %c1_i32_21 = arith.constant 1 : i32
    %65 = tpu.dynamic_rotate %45 by %c1_i32_21 dim 1 : vector<8x512xf32>, i32 -> vector<8x512xf32>
    %cst_22 = arith.constant 0.000000e+00 : f32
    %66 = vector.shape_cast %38 : vector<1x512xi1> to vector<1x512xi1>
    %67 = vector.broadcast %66 : vector<1x512xi1> to vector<8x512xi1>
    %68 = vector.broadcast %cst_22 : f32 to vector<8x512xf32>
    %69 = arith.select %67, %65, %68 : vector<8x512xi1>, vector<8x512xf32>
    %c511_i32 = arith.constant 511 : i32
    %70 = tpu.dynamic_rotate %45 by %c511_i32 dim 1 : vector<8x512xf32>, i32 -> vector<8x512xf32>
    %cst_23 = arith.constant 0.000000e+00 : f32
    %71 = vector.shape_cast %40 : vector<1x512xi1> to vector<1x512xi1>
    %72 = vector.broadcast %71 : vector<1x512xi1> to vector<8x512xi1>
    %73 = vector.broadcast %cst_23 : f32 to vector<8x512xf32>
    %74 = arith.select %72, %70, %73 : vector<8x512xi1>, vector<8x512xf32>
    %c497_i32 = arith.constant 497 : i32
    %75 = tpu.dynamic_rotate %45 by %c497_i32 dim 1 : vector<8x512xf32>, i32 -> vector<8x512xf32>
    %76 = arith.andi %36, %38 : vector<1x512xi1>
    %cst_24 = arith.constant 0.000000e+00 : f32
    %77 = vector.shape_cast %76 : vector<1x512xi1> to vector<1x512xi1>
    %78 = vector.broadcast %77 : vector<1x512xi1> to vector<8x512xi1>
    %79 = vector.broadcast %cst_24 : f32 to vector<8x512xf32>
    %80 = arith.select %78, %75, %79 : vector<8x512xi1>, vector<8x512xf32>
    %c496_i32 = arith.constant 496 : i32
    %81 = tpu.dynamic_rotate %45 by %c496_i32 dim 1 : vector<8x512xf32>, i32 -> vector<8x512xf32>
    %cst_25 = arith.constant 0.000000e+00 : f32
    %82 = vector.shape_cast %36 : vector<1x512xi1> to vector<1x512xi1>
    %83 = vector.broadcast %82 : vector<1x512xi1> to vector<8x512xi1>
    %84 = vector.broadcast %cst_25 : f32 to vector<8x512xf32>
    %85 = arith.select %83, %81, %84 : vector<8x512xi1>, vector<8x512xf32>
    %c495_i32 = arith.constant 495 : i32
    %86 = tpu.dynamic_rotate %45 by %c495_i32 dim 1 : vector<8x512xf32>, i32 -> vector<8x512xf32>
    %87 = arith.andi %36, %40 : vector<1x512xi1>
    %cst_26 = arith.constant 0.000000e+00 : f32
    %88 = vector.shape_cast %87 : vector<1x512xi1> to vector<1x512xi1>
    %89 = vector.broadcast %88 : vector<1x512xi1> to vector<8x512xi1>
    %90 = vector.broadcast %cst_26 : f32 to vector<8x512xf32>
    %91 = arith.select %89, %86, %90 : vector<8x512xi1>, vector<8x512xf32>
    %92 = tpu.concatenate %53, %58, %64, %69, %45, %74, %80, %85, %91 in 0 : vector<8x512xf32>, vector<8x512xf32>, vector<8x512xf32>, vector<8x512xf32>, vector<8x512xf32>, vector<8x512xf32>, vector<8x512xf32>, vector<8x512xf32>, vector<8x512xf32> -> vector<72x512xf32>
    %cst_27 = arith.constant dense<0.000000e+00> : vector<8x512xf32>
    %93 = tpu.matmul %46, %92, %cst_27 {dimension_numbers = #tpu.dot_dimension_numbers<[1], [0], [0], [1], [0, 0, 1, 1], [], []>} : vector<8x72xf32>, vector<72x512xf32>, vector<8x512xf32> -> vector<8x512xf32>
    %94 = vector.broadcast %47 : vector<8x1xf32> to vector<8x512xf32>
    %95 = arith.addf %93, %94 : vector<8x512xf32>
    %cst_28 = arith.constant 0.000000e+00 : f32
    %96 = vector.broadcast %cst_28 : f32 to vector<8x512xf32>
    %97 = arith.maximumf %95, %96 : vector<8x512xf32>
    %c0_29 = arith.constant 0 : index
    %c0_30 = arith.constant 0 : index
    %98 = vector.load %arg4[%c0_29, %c0_30] : memref<8x72xf32, #tpu.memory_space<vmem>>, vector<8x72xf32>
    %c0_31 = arith.constant 0 : index
    %c0_32 = arith.constant 0 : index
    %99 = vector.load %arg5[%c0_31, %c0_32] : memref<8x1xf32, #tpu.memory_space<vmem>>, vector<8x1xf32>
    %c17_i32_33 = arith.constant 17 : i32
    %100 = tpu.dynamic_rotate %97 by %c17_i32_33 dim 1 : vector<8x512xf32>, i32 -> vector<8x512xf32>
    %101 = arith.andi %34, %38 : vector<1x512xi1>
    %cst_34 = arith.constant 0.000000e+00 : f32
    %102 = vector.shape_cast %101 : vector<1x512xi1> to vector<1x512xi1>
    %103 = vector.broadcast %102 : vector<1x512xi1> to vector<8x512xi1>
    %104 = vector.broadcast %cst_34 : f32 to vector<8x512xf32>
    %105 = arith.select %103, %100, %104 : vector<8x512xi1>, vector<8x512xf32>
    %c16_i32_35 = arith.constant 16 : i32
    %106 = tpu.dynamic_rotate %97 by %c16_i32_35 dim 1 : vector<8x512xf32>, i32 -> vector<8x512xf32>
    %cst_36 = arith.constant 0.000000e+00 : f32
    %107 = vector.shape_cast %34 : vector<1x512xi1> to vector<1x512xi1>
    %108 = vector.broadcast %107 : vector<1x512xi1> to vector<8x512xi1>
    %109 = vector.broadcast %cst_36 : f32 to vector<8x512xf32>
    %110 = arith.select %108, %106, %109 : vector<8x512xi1>, vector<8x512xf32>
    %c15_i32_37 = arith.constant 15 : i32
    %111 = tpu.dynamic_rotate %97 by %c15_i32_37 dim 1 : vector<8x512xf32>, i32 -> vector<8x512xf32>
    %112 = arith.andi %34, %40 : vector<1x512xi1>
    %cst_38 = arith.constant 0.000000e+00 : f32
    %113 = vector.shape_cast %112 : vector<1x512xi1> to vector<1x512xi1>
    %114 = vector.broadcast %113 : vector<1x512xi1> to vector<8x512xi1>
    %115 = vector.broadcast %cst_38 : f32 to vector<8x512xf32>
    %116 = arith.select %114, %111, %115 : vector<8x512xi1>, vector<8x512xf32>
    %c1_i32_39 = arith.constant 1 : i32
    %117 = tpu.dynamic_rotate %97 by %c1_i32_39 dim 1 : vector<8x512xf32>, i32 -> vector<8x512xf32>
    %cst_40 = arith.constant 0.000000e+00 : f32
    %118 = vector.shape_cast %38 : vector<1x512xi1> to vector<1x512xi1>
    %119 = vector.broadcast %118 : vector<1x512xi1> to vector<8x512xi1>
    %120 = vector.broadcast %cst_40 : f32 to vector<8x512xf32>
    %121 = arith.select %119, %117, %120 : vector<8x512xi1>, vector<8x512xf32>
    %c511_i32_41 = arith.constant 511 : i32
    %122 = tpu.dynamic_rotate %97 by %c511_i32_41 dim 1 : vector<8x512xf32>, i32 -> vector<8x512xf32>
    %cst_42 = arith.constant 0.000000e+00 : f32
    %123 = vector.shape_cast %40 : vector<1x512xi1> to vector<1x512xi1>
    %124 = vector.broadcast %123 : vector<1x512xi1> to vector<8x512xi1>
    %125 = vector.broadcast %cst_42 : f32 to vector<8x512xf32>
    %126 = arith.select %124, %122, %125 : vector<8x512xi1>, vector<8x512xf32>
    %c497_i32_43 = arith.constant 497 : i32
    %127 = tpu.dynamic_rotate %97 by %c497_i32_43 dim 1 : vector<8x512xf32>, i32 -> vector<8x512xf32>
    %128 = arith.andi %36, %38 : vector<1x512xi1>
    %cst_44 = arith.constant 0.000000e+00 : f32
    %129 = vector.shape_cast %128 : vector<1x512xi1> to vector<1x512xi1>
    %130 = vector.broadcast %129 : vector<1x512xi1> to vector<8x512xi1>
    %131 = vector.broadcast %cst_44 : f32 to vector<8x512xf32>
    %132 = arith.select %130, %127, %131 : vector<8x512xi1>, vector<8x512xf32>
    %c496_i32_45 = arith.constant 496 : i32
    %133 = tpu.dynamic_rotate %97 by %c496_i32_45 dim 1 : vector<8x512xf32>, i32 -> vector<8x512xf32>
    %cst_46 = arith.constant 0.000000e+00 : f32
    %134 = vector.shape_cast %36 : vector<1x512xi1> to vector<1x512xi1>
    %135 = vector.broadcast %134 : vector<1x512xi1> to vector<8x512xi1>
    %136 = vector.broadcast %cst_46 : f32 to vector<8x512xf32>
    %137 = arith.select %135, %133, %136 : vector<8x512xi1>, vector<8x512xf32>
    %c495_i32_47 = arith.constant 495 : i32
    %138 = tpu.dynamic_rotate %97 by %c495_i32_47 dim 1 : vector<8x512xf32>, i32 -> vector<8x512xf32>
    %139 = arith.andi %36, %40 : vector<1x512xi1>
    %cst_48 = arith.constant 0.000000e+00 : f32
    %140 = vector.shape_cast %139 : vector<1x512xi1> to vector<1x512xi1>
    %141 = vector.broadcast %140 : vector<1x512xi1> to vector<8x512xi1>
    %142 = vector.broadcast %cst_48 : f32 to vector<8x512xf32>
    %143 = arith.select %141, %138, %142 : vector<8x512xi1>, vector<8x512xf32>
    %144 = tpu.concatenate %105, %110, %116, %121, %97, %126, %132, %137, %143 in 0 : vector<8x512xf32>, vector<8x512xf32>, vector<8x512xf32>, vector<8x512xf32>, vector<8x512xf32>, vector<8x512xf32>, vector<8x512xf32>, vector<8x512xf32>, vector<8x512xf32> -> vector<72x512xf32>
    %cst_49 = arith.constant dense<0.000000e+00> : vector<8x512xf32>
    %145 = tpu.matmul %98, %144, %cst_49 {dimension_numbers = #tpu.dot_dimension_numbers<[1], [0], [0], [1], [0, 0, 1, 1], [], []>} : vector<8x72xf32>, vector<72x512xf32>, vector<8x512xf32> -> vector<8x512xf32>
    %146 = vector.broadcast %99 : vector<8x1xf32> to vector<8x512xf32>
    %147 = arith.addf %145, %146 : vector<8x512xf32>
    %cst_50 = arith.constant 0.000000e+00 : f32
    %148 = vector.broadcast %cst_50 : f32 to vector<8x512xf32>
    %149 = arith.maximumf %147, %148 : vector<8x512xf32>
    %150 = vector.extract_strided_slice %149 {offsets = [0, 0], sizes = [8, 256], strides = [1, 1]} : vector<8x512xf32> to vector<8x256xf32>
    %c0_51 = arith.constant 0 : index
    %c0_52 = arith.constant 0 : index
    %c0_53 = arith.constant 0 : index
    %151 = vector.load %arg6[%c0_51, %c0_52, %c0_53] : memref<2x8x256xf32, #tpu.memory_space<vmem>>, vector<1x8x256xf32>
    %152 = vector.shape_cast %151 : vector<1x8x256xf32> to vector<8x256xf32>
    %153 = vector.shape_cast %150 : vector<8x256xf32> to vector<1x8x256xf32>
    tpu.vector_store %arg6[%c0_51, %c0_52, %c0_53], %153 {strides = array<i32>} : memref<2x8x256xf32, #tpu.memory_space<vmem>>, vector<1x8x256xf32>,
    %154 = vector.extract_strided_slice %149 {offsets = [0, 256], sizes = [8, 256], strides = [1, 1]} : vector<8x512xf32> to vector<8x256xf32>
    %c1_54 = arith.constant 1 : index
    %c0_55 = arith.constant 0 : index
    %c0_56 = arith.constant 0 : index
    %155 = vector.load %arg6[%c1_54, %c0_55, %c0_56] : memref<2x8x256xf32, #tpu.memory_space<vmem>>, vector<1x8x256xf32>
    %156 = vector.shape_cast %155 : vector<1x8x256xf32> to vector<8x256xf32>
    %157 = vector.shape_cast %154 : vector<8x256xf32> to vector<1x8x256xf32>
    tpu.vector_store %arg6[%c1_54, %c0_55, %c0_56], %157 {strides = array<i32>} : memref<2x8x256xf32, #tpu.memory_space<vmem>>, vector<1x8x256xf32>,
    return
  }
  func.func @transform_0(%arg0: i32) -> (i32, i32, i32) {
    %c0_i32 = arith.constant 0 : i32
    %c0_i32_0 = arith.constant 0 : i32
    %c0_i32_1 = arith.constant 0 : i32
    return %arg0, %c0_i32, %c0_i32_0 : i32, i32, i32
  }
  func.func @transform_1(%arg0: i32) -> (i32, i32) {
    %c0_i32 = arith.constant 0 : i32
    %c0_i32_0 = arith.constant 0 : i32
    %c0_i32_1 = arith.constant 0 : i32
    return %c0_i32, %c0_i32_0 : i32, i32
  }
  func.func @transform_2(%arg0: i32) -> (i32, i32) {
    %c0_i32 = arith.constant 0 : i32
    %c0_i32_0 = arith.constant 0 : i32
    %c0_i32_1 = arith.constant 0 : i32
    return %c0_i32, %c0_i32_0 : i32, i32
  }
  func.func @transform_3(%arg0: i32) -> (i32, i32) {
    %c0_i32 = arith.constant 0 : i32
    %c0_i32_0 = arith.constant 0 : i32
    %c0_i32_1 = arith.constant 0 : i32
    return %c0_i32, %c0_i32_0 : i32, i32
  }
  func.func @transform_4(%arg0: i32) -> (i32, i32) {
    %c0_i32 = arith.constant 0 : i32
    %c0_i32_0 = arith.constant 0 : i32
    %c0_i32_1 = arith.constant 0 : i32
    return %c0_i32, %c0_i32_0 : i32, i32
  }
  func.func @transform_5(%arg0: i32) -> (i32, i32, i32) {
    %c0_i32 = arith.constant 0 : i32
    %c0_i32_0 = arith.constant 0 : i32
    %c0_i32_1 = arith.constant 0 : i32
    return %arg0, %c0_i32, %c0_i32_0 : i32, i32, i32
  }
}

</mosaic_0001>

<bundles_post_ra>
// kernel: smooth_forward.1
= control target key start
LH: loop header
LB: loop body
LE: loop exit
PB: predicated region body
PF: predicated region fallthrough
CT: control target
= control target key end

     0   :  { %s883_s22 = smov 111   ;;  %s884_s27 = smov 112   ;;  %v890_v4 = vmov 0.0   ;;  %v891_v5 = vmov 0   ;;  %v20_v7 = vlaneseq  ;;  %s1480_s0 = inlined_call_operand.vmem [shape: f32[2,8,256], index: 0, kind: input, shape index: {}]   ;;  %s1481_s2 = inlined_call_operand.vmem [shape: f32[8,1], index: 2, kind: input, shape index: {}]   ;;  %s1482_s1 = inlined_call_operand.vmem [shape: f32[8,72], index: 1, kind: input, shape index: {}]   ;;  %s1483_s4 = inlined_call_operand.vmem [shape: f32[8,1], index: 4, kind: input, shape index: {}]   ;;  %s1484_s3 = inlined_call_operand.vmem [shape: f32[8,72], index: 3, kind: input, shape index: {}]   ;;  %s1485_s5 = inlined_call_operand.vmem [shape: f32[2,8,256], index: 5, kind: output, shape index: {}]  }
   0x1   :  { %v926_v0 = vld [vmem:[%s1480_s0 + $0x10] sm:$0xff]  ;;  %v931_v1 = vld [vmem:[%s1480_s0] sm:$0xff]  ;;  %v940_v2 = vld [vmem:[%s1480_s0 + $0x18] sm:$0xff]  ;;  %s886_s28 = smov 127   ;;  %s887_s29 = smov 1   ;;  %433 = vmatprep.mubr.f32.mxu0 %v890_v4  ;;  %504 = vmatprep.mubr.f32.mxu1 %v890_v4 }
   0x2   :  { %335 = vrot.lane.b32.xlu1 %v926_v0, %s883_s22  ;;  %331 = vrot.lane.b32.xlu0 %v931_v1, %s883_s22  ;;  %v945_v3 = vld [vmem:[%s1480_s0 + $0x8] sm:$0xff]  ;;  %s885_s0 = smov 113   ;;  %s888_s30 = smov 15   ;;  %v143_v6 = vld [vmem:[%s1481_s2] sm:$0xff]  ;;  %v1012_v8 = vand.u32 127, %v20_v7 }
   0x3   :  { %s889_s6 = smov 16   ;;  %882 = vset.pattern.permute.xlu0 %v891_v5  ;;  %s892_s7 = smov 17  }
   0x4   :  { %v22_v9 = vadd.s32 128, %v1012_v8  ;;  %v24_v10 = vadd.s32 384, %v1012_v8  ;;  %v1017_v13 = vadd.s32 256, %v1012_v8  ;;  %v29_v16 = vand.u32 255, %v1012_v8 }
   0x5   :  { %vm1487_vm4 = vcmp.lt.s32.totalorder %v1012_v8, 111  ;;  %vm1486_vm9 = vcmp.lt.s32.totalorder %v1012_v8, 112  ;;  %vm1488_vm13 = vcmp.lt.s32.totalorder %v1012_v8, 113 }
   0x6   :  { %337 = vrot.lane.b32.xlu1 %v940_v2, %s883_s22  ;;  %333 = vrot.lane.b32.xlu0 %v945_v3, %s883_s22  ;;  %v36_v11 = vand.u32 255, %v22_v9  ;;  %v50_v12 = vand.u32 255, %v24_v10  ;;  %v43_v17 = vand.u32 255, %v1017_v13  ;;  %v1037_v22 = vand.u32 15, %v29_v16 }
   0x8   :  { %v1019_v14 = vand.u32 15, %v36_v11  ;;  %v1021_v15 = vand.u32 15, %v50_v12  ;;  %vm1025_vm0 = vcmp.lt.s32.totalorder %v36_v11, 240  ;;  %vm1030_vm2 = vcmp.lt.s32.totalorder %v50_v12, 240 }
   0x9   :  { %v1041_v23 = vand.u32 15, %v43_v17  ;;  %vm1499_vm7 = vcmp.le.s32.totalorder %v1037_v22, 14  ;;  %vm1500_vm15 = vcmp.ge.s32.totalorder %v1037_v22, 1 }
   0xa   :  { %308 = vrot.lane.b32.xlu1 %v945_v3, %s884_s27  ;;  %306 = vrot.lane.b32.xlu0 %v931_v1, %s884_s27  ;;  %vm1494_vm1 = vcmp.le.s32.totalorder %v1019_v14, 14  ;;  %vm1496_vm3 = vcmp.le.s32.totalorder %v1021_v15, 14  ;;  %vm1490_vm10 = vcmp.ge.s32.totalorder %v1019_v14, 1  ;;  %vm1492_vm11 = vcmp.ge.s32.totalorder %v1021_v15, 1 }
   0xb   :  { %vm1048_vm5 = vmand %vm1025_vm0, %vm1494_vm1  ;;  %vm1498_vm8 = vcmp.le.s32.totalorder %v1041_v23, 14 }
   0xc   :  { %vm1056_vm6 = vmand %vm1030_vm2, %vm1496_vm3 }
   0xd   :  { %vm1097_vm12 = vmand %vm1025_vm0, %vm1490_vm10 }
   0xe   :  { %312 = vrot.lane.b32.xlu1 %v940_v2, %s884_s27  ;;  %310 = vrot.lane.b32.xlu0 %v926_v0, %s884_s27  ;;  %vm1106_vm14 = vmand %vm1030_vm2, %vm1492_vm11 }
  0x12   :  { %279 = vrot.lane.b32.xlu1 %v945_v3, %s885_s0  ;;  %277 = vrot.lane.b32.xlu0 %v931_v1, %s885_s0 }
  0x16   :  { %283 = vrot.lane.b32.xlu1 %v940_v2, %s885_s0  ;;  %281 = vrot.lane.b32.xlu0 %v926_v0, %s885_s0 }
  0x1a   :  { %254 = vrot.lane.b32.xlu1 %v945_v3, %s886_s28  ;;  %252 = vrot.lane.b32.xlu0 %v931_v1, %s886_s28 }
  0x1e   :  { %258 = vrot.lane.b32.xlu1 %v940_v2, %s886_s28  ;;  %256 = vrot.lane.b32.xlu0 %v926_v0, %s886_s28 }
  0x22   :  { %229 = vrot.lane.b32.xlu1 %v945_v3, %s887_s29  ;;  %227 = vrot.lane.b32.xlu0 %v931_v1, %s887_s29 }
  0x26   :  { %233 = vrot.lane.b32.xlu1 %v940_v2, %s887_s29  ;;  %231 = vrot.lane.b32.xlu0 %v926_v0, %s887_s29 }
  0x2a   :  { %200 = vrot.lane.b32.xlu1 %v945_v3, %s888_s30  ;;  %198 = vrot.lane.b32.xlu0 %v931_v1, %s888_s30 }
  0x2e   :  { %204 = vrot.lane.b32.xlu1 %v940_v2, %s888_s30  ;;  %202 = vrot.lane.b32.xlu0 %v926_v0, %s888_s30 }
  0x32   :  { %175 = vrot.lane.b32.xlu1 %v945_v3, %s889_s6  ;;  %173 = vrot.lane.b32.xlu0 %v931_v1, %s889_s6 }
  0x36   :  { %179 = vrot.lane.b32.xlu1 %v940_v2, %s889_s6  ;;  %177 = vrot.lane.b32.xlu0 %v926_v0, %s889_s6 }
  0x3a   :  { %146 = vrot.lane.b32.xlu1 %v945_v3, %s892_s7  ;;  %144 = vrot.lane.b32.xlu0 %v931_v1, %s892_s7 }
  0x3e   :  { %150 = vrot.lane.b32.xlu1 %v940_v2, %s892_s7  ;;  %148 = vrot.lane.b32.xlu0 %v926_v0, %s892_s7 }
  0x42   :  { %362 = vperm.xlu0 %882, %v143_v6  }
  0x74   :  { %v336_v19 = vpop.permute.xlu1 %335  ;;  %v332_v20 = vpop.permute.xlu0 %331 }
  0x78   :  { %v338_v26 = vpop.permute.xlu1 %337  ;;  %v334_v27 = vpop.permute.xlu0 %333 }
  0x79   :  { %v341_v28 = vsel %vm1487_vm4, %v334_v27, %v336_v19  ;;  %v343_v29 = vsel %vm1487_vm4, %v338_v26, %v332_v20  ;;  %v342_v30 = vsel %vm1487_vm4, %v332_v20, %v334_v27  ;;  %v340_v31 = vsel %vm1487_vm4, %v336_v19, %v338_v26 }
  0x7a   :  { %810 = vmatprep.subr.msk.mxu0 %vm1048_vm5, %v341_v28  ;;  %825 = vmatprep.subr.msk.mxu1 %vm1056_vm6, %v343_v29  ;;  %vm1489_vm4 = vcmp.lt.s32.totalorder %v1012_v8, 127 }
  0x7b   :  { %811 = vmatpush1.msk.msra.mxu0 %vm1499_vm7, %v342_v30  ;;  %826 = vmatpush1.msk.msra.mxu1 %vm1498_vm8, %v340_v31 }
  0x7c   :  { %v309_v32 = vpop.permute.xlu1 %308  ;;  %v307_v33 = vpop.permute.xlu0 %306 }
  0x7d   :  { %v317_v39 = vsel %vm1486_vm9, %v307_v33, %v309_v32 }
  0x80   :  { %v313_v34 = vpop.permute.xlu1 %312  ;;  %v311_v35 = vpop.permute.xlu0 %310 }
  0x81   :  { %v318_v36 = vsel %vm1486_vm9, %v313_v34, %v307_v33  ;;  %v316_v37 = vsel %vm1486_vm9, %v309_v32, %v311_v35  ;;  %v315_v38 = vsel %vm1486_vm9, %v311_v35, %v313_v34  ;;  %vm1493_vm9 = vcmp.ge.s32.totalorder %v1041_v23, 1 }
  0x82   :  { %812 = vmatprep.subr.msk.mxu0 %vm1025_vm0, %v316_v37  ;;  %827 = vmatprep.subr.msk.mxu1 %vm1030_vm2, %v318_v36 }
  0x83   :  { %386 = vmatpush1.msra.mxu0 %v317_v39  ;;  %457 = vmatpush1.msra.mxu1 %v315_v38  ;;  %v142_v38 = vld [vmem:[%s1482_s1] sm:$0xff]  ;;  %v1528_v39 = vmov 0 }
  0x84   :  { %v280_v40 = vpop.permute.xlu1 %279  ;;  %v278_v41 = vpop.permute.xlu0 %277 }
  0x85   :  { %v288_v49 = vsel %vm1488_vm13, %v278_v41, %v280_v40 }
  0x88   :  { %v284_v44 = vpop.permute.xlu1 %283  ;;  %v282_v45 = vpop.permute.xlu0 %281 }
  0x89   :  { %v289_v46 = vsel %vm1488_vm13, %v284_v44, %v278_v41  ;;  %v286_v47 = vsel %vm1488_vm13, %v282_v45, %v284_v44  ;;  %v287_v48 = vsel %vm1488_vm13, %v280_v40, %v282_v45  ;;  %vm1491_vm13 = vcmp.lt.s32.totalorder %v1012_v8, 1 }
  0x8a   :  { %813 = vmatprep.subr.msk.mxu0 %vm1097_vm12, %v287_v48  ;;  %828 = vmatprep.subr.msk.mxu1 %vm1106_vm14, %v289_v46 }
  0x8b   :  { %814 = vmatpush1.msk.msra.mxu0 %vm1500_vm15, %v288_v49  ;;  %829 = vmatpush1.msk.msra.mxu1 %vm1493_vm9, %v286_v47 }
  0x8c   :  { %v255_v50 = vpop.permute.xlu1 %254  ;;  %v253_v51 = vpop.permute.xlu0 %252 }
  0x8d   :  { %v263_v57 = vsel %vm1489_vm4, %v253_v51, %v255_v50 }
  0x90   :  { %v259_v52 = vpop.permute.xlu1 %258  ;;  %v257_v53 = vpop.permute.xlu0 %256 }
  0x91   :  { %v264_v54 = vsel %vm1489_vm4, %v259_v52, %v253_v51  ;;  %v261_v55 = vsel %vm1489_vm4, %v257_v53, %v259_v52  ;;  %v262_v56 = vsel %vm1489_vm4, %v255_v50, %v257_v53  ;;  %vm1495_vm4 = vcmp.lt.s32.totalorder %v1012_v8, 15 }
  0x92   :  { %815 = vmatprep.subr.msk.mxu0 %vm1494_vm1, %v262_v56  ;;  %830 = vmatprep.subr.msk.mxu1 %vm1496_vm3, %v264_v54 }
  0x93   :  { %816 = vmatpush1.msk.msra.mxu0 %vm1499_vm7, %v263_v57  ;;  %831 = vmatpush1.msk.msra.mxu1 %vm1498_vm8, %v261_v55  ;;  %v516_v57 = vld [vmem:[%s1483_s4] sm:$0xff] }
  0x94   :  { %v230_v58 = vpop.permute.xlu1 %229  ;;  %391 = vmatprep.subr.mxu0 %v945_v3  ;;  %v228_v59 = vpop.permute.xlu0 %227  ;;  %462 = vmatprep.subr.mxu1 %v940_v2 }
  0x95   :  { %v238_v60 = vsel %vm1491_vm13, %v228_v59, %v230_v58  ;;  %392 = vmatpush1.msra.mxu0 %v931_v1  ;;  %463 = vmatpush1.msra.mxu1 %v926_v0 }
  0x96   :  { %817 = vmatprep.subr.msk.mxu0 %vm1490_vm10, %v238_v60  ;;  %vm1169_vm10 = vcmp.ge.s32.totalorder %v29_v16, 16 }
  0x98   :  { %v234_v61 = vpop.permute.xlu1 %233  ;;  %v232_v62 = vpop.permute.xlu0 %231 }
  0x99   :  { %v239_v63 = vsel %vm1491_vm13, %v234_v61, %v228_v59  ;;  %v236_v3 = vsel %vm1491_vm13, %v232_v62, %v234_v61  ;;  %v237_v2 = vsel %vm1491_vm13, %v230_v58, %v232_v62  ;;  %vm1177_vm13 = vcmp.ge.s32.totalorder %v43_v17, 16 }
  0x9a   :  { %818 = vmatpush1.msk.msra.mxu0 %vm1500_vm15, %v239_v63  ;;  %832 = vmatprep.subr.msk.mxu1 %vm1492_vm11, %v236_v3  ;;  %vm1187_vm11 = vmand %vm1169_vm10, %vm1499_vm7  ;;  %vm1527_vm7 = vcmp.ge.s32.totalorder %v1041_v23, 1 }
  0x9b   :  { %833 = vmatpush1.msk.msra.mxu1 %vm1493_vm9, %v237_v2  ;;  %vm1195_vm9 = vmand %vm1177_vm13, %vm1498_vm8  ;;  %vm1501_vm8 = vcmask 588800  }
  0x9c   :  { %v201_v0 = vpop.permute.xlu1 %200  ;;  %v199_v1 = vpop.permute.xlu0 %198 }
  0x9d   :  { %v209_v6 = vsel %vm1495_vm4, %v199_v1, %v201_v0 }
  0x9e   :  { %819 = vmatprep.subr.msk.mxu0 %vm1494_vm1, %v209_v6  ;;  %vm1497_vm1 = vcmp.lt.s32.totalorder %v1012_v8, 16 }
  0xa0   :  { %v205_v10 = vpop.permute.xlu1 %204  ;;  %v203_v11 = vpop.permute.xlu0 %202 }
  0xa1   :  { %v210_v13 = vsel %vm1495_vm4, %v205_v10, %v199_v1  ;;  %v207_v16 = vsel %vm1495_vm4, %v203_v11, %v205_v10  ;;  %v208_v17 = vsel %vm1495_vm4, %v201_v0, %v203_v11  ;;  %vm1502_vm4 = vcmp.lt.s32.totalorder %v1012_v8, 17 }
  0xa2   :  { %820 = vmatpush1.msk.msra.mxu0 %vm1187_vm11, %v210_v13  ;;  %834 = vmatprep.subr.msk.mxu1 %vm1496_vm3, %v207_v16  ;;  %vm1524_vm3 = vcmp.ge.s32.totalorder %v1019_v14, 1 }
  0xa3   :  { %835 = vmatpush1.msk.msra.mxu1 %vm1195_vm9, %v208_v17 }
  0xa4   :  { %v176_v19 = vpop.permute.xlu1 %175  ;;  %v174_v20 = vpop.permute.xlu0 %173 }
  0xa5   :  { %v184_v26 = vsel %vm1497_vm1, %v174_v20, %v176_v19 }
  0xa6   :  { %397 = vmatprep.subr.mxu0 %v184_v26 }
  0xa8   :  { %v180_v27 = vpop.permute.xlu1 %179  ;;  %v178_v28 = vpop.permute.xlu0 %177 }
  0xa9   :  { %v185_v29 = vsel %vm1497_vm1, %v180_v27, %v174_v20  ;;  %v183_v30 = vsel %vm1497_vm1, %v176_v19, %v178_v28  ;;  %v182_v31 = vsel %vm1497_vm1, %v178_v28, %v180_v27  ;;  %vm1233_vm1 = vmand %vm1169_vm10, %vm1500_vm15  ;;  %vm1530_vm15 = vcmp.ge.s32.totalorder %v1021_v15, 1 }
  0xaa   :  { %821 = vmatpush1.msk.msra.mxu0 %vm1169_vm10, %v185_v29  ;;  %468 = vmatprep.subr.mxu1 %v182_v31 }
  0xab   :  { %836 = vmatpush1.msk.msra.mxu1 %vm1177_vm13, %v183_v30 }
  0xac   :  { %v147_v32 = vpop.permute.xlu1 %146  ;;  %v145_v33 = vpop.permute.xlu0 %144 }
  0xad   :  { %v155_v34 = vsel %vm1502_vm4, %v145_v33, %v147_v32 }
  0xae   :  { %822 = vmatprep.subr.msk.mxu0 %vm1524_vm3, %v155_v34  ;;  %vm1244_vm3 = vmand %vm1177_vm13, %vm1527_vm7  ;;  %vm1531_vm7 = vcmp.lt.s32.totalorder %v1012_v8, 111 }
  0xaf   :  { %v1529_v39 = vsel %vm1244_vm3, 4294967295, %v1528_v39 }
  0xb0   :  { %v151_v36 = vpop.permute.xlu1 %150  ;;  %v149_v37 = vpop.permute.xlu0 %148 }
  0xb1   :  { %v156_v40 = vsel %vm1502_vm4, %v151_v36, %v145_v33  ;;  %v153_v41 = vsel %vm1502_vm4, %v149_v37, %v151_v36  ;;  %v154_v44 = vsel %vm1502_vm4, %v147_v32, %v149_v37  ;;  %vm1534_vm4 = vmmov %vm1531_vm7 }
  0xb2   :  { %823 = vmatpush1.msk.msra.mxu0 %vm1233_vm1, %v156_v40  ;;  %837 = vmatprep.subr.msk.mxu1 %vm1530_vm15, %v153_v41  ;;  %vm1532_vm15 = vmmov %vm1531_vm7 }
  0xb3   :  { %824 = vmatmul.mubr.msk.f32.vlgmr.msra.gmra.mxu0 %vm1501_vm8, %v142_v38  ;;  %838 = vmatpush1.msk.msra.mxu1 %vm1244_vm3, %v154_v44  ;;  %vm1535_vm3 = vmmov %vm1534_vm4 }
  0xb4   :  { %839 = vmatmul.mubr.msk.f32.vlgmr.msra.gmra.mxu1 %vm1501_vm8, %v142_v38  ;;  %717 = vmatprep.mubr.f32.mxu0 %v890_v4  ;;  %vm1533_vm8 = vcmp.le.s32.totalorder %v1037_v22, 14 }
  0xb5   :  { %788 = vmatprep.mubr.f32.mxu1 %v890_v4 }
  0xbd   :  { %v363_v45 = vpop.permute.xlu0 %362 }
 0x173   :  { %v435_v46 = vpop.f32.mrf.mxu0 }
 0x174   :  { %v436_v47 = vadd.f32 %v435_v46, %v363_v45  ;;  %v506_v48 = vpop.f32.mrf.mxu1 }
 0x175   :  { %v507_v49 = vadd.f32 %v506_v48, %v363_v45  ;;  %v437_v50 = vpop.f32.mrf.mxu0 }
 0x176   :  { %v1264_v51 = vmax.f32 %v436_v47, 0.0  ;;  %v438_v52 = vadd.f32 %v437_v50, %v363_v45  ;;  %v508_v54 = vpop.f32.mrf.mxu1 }
 0x177   :  { %v1266_v53 = vmax.f32 %v507_v49, 0.0  ;;  %v509_v4 = vadd.f32 %v508_v54, %v363_v45 }
 0x178   :  { %629 = vrot.lane.b32.xlu1 %v1264_v51, %s883_s22  ;;  %v1272_v55 = vmax.f32 %v438_v52, 0.0 }
 0x179   :  { %633 = vrot.lane.b32.xlu0 %v1266_v53, %s883_s22  ;;  %v1278_v56 = vmax.f32 %v509_v4, 0.0 }
 0x17c   :  { %631 = vrot.lane.b32.xlu1 %v1272_v55, %s883_s22 }
 0x17d   :  { %613 = vrot.lane.b32.xlu0 %v1264_v51, %s884_s27 }
 0x180   :  { %635 = vrot.lane.b32.xlu1 %v1278_v56, %s883_s22 }
 0x181   :  { %617 = vrot.lane.b32.xlu0 %v1266_v53, %s884_s27 }
 0x184   :  { %615 = vrot.lane.b32.xlu1 %v1272_v55, %s884_s27 }
 0x185   :  { %597 = vrot.lane.b32.xlu0 %v1264_v51, %s885_s0 }
 0x188   :  { %619 = vrot.lane.b32.xlu1 %v1278_v56, %s884_s27 }
 0x189   :  { %601 = vrot.lane.b32.xlu0 %v1266_v53, %s885_s0 }
 0x18c   :  { %599 = vrot.lane.b32.xlu1 %v1272_v55, %s885_s0 }
 0x18d   :  { %581 = vrot.lane.b32.xlu0 %v1264_v51, %s886_s28 }
 0x190   :  { %603 = vrot.lane.b32.xlu1 %v1278_v56, %s885_s0 }
 0x191   :  { %585 = vrot.lane.b32.xlu0 %v1266_v53, %s886_s28 }
 0x194   :  { %583 = vrot.lane.b32.xlu1 %v1272_v55, %s886_s28 }
 0x195   :  { %565 = vrot.lane.b32.xlu0 %v1264_v51, %s887_s29 }
 0x198   :  { %587 = vrot.lane.b32.xlu1 %v1278_v56, %s886_s28 }
 0x199   :  { %569 = vrot.lane.b32.xlu0 %v1266_v53, %s887_s29 }
 0x19c   :  { %567 = vrot.lane.b32.xlu1 %v1272_v55, %s887_s29 }
 0x19d   :  { %549 = vrot.lane.b32.xlu0 %v1264_v51, %s888_s30 }
 0x1a0   :  { %571 = vrot.lane.b32.xlu1 %v1278_v56, %s887_s29 }
 0x1a1   :  { %553 = vrot.lane.b32.xlu0 %v1266_v53, %s888_s30 }
 0x1a4   :  { %551 = vrot.lane.b32.xlu1 %v1272_v55, %s888_s30 }
 0x1a5   :  { %533 = vrot.lane.b32.xlu0 %v1264_v51, %s889_s6 }
 0x1a8   :  { %555 = vrot.lane.b32.xlu1 %v1278_v56, %s888_s30 }
 0x1a9   :  { %537 = vrot.lane.b32.xlu0 %v1266_v53, %s889_s6 }
 0x1ac   :  { %535 = vrot.lane.b32.xlu1 %v1272_v55, %s889_s6 }
 0x1ad   :  { %517 = vrot.lane.b32.xlu0 %v1264_v51, %s892_s7 }
 0x1b0   :  { %539 = vrot.lane.b32.xlu1 %v1278_v56, %s889_s6 }
 0x1b1   :  { %521 = vrot.lane.b32.xlu0 %v1266_v53, %s892_s7 }
 0x1b4   :  { %519 = vrot.lane.b32.xlu1 %v1272_v55, %s892_s7 }
 0x1b5   :  { %647 = vperm.xlu0 %882, %v516_v57  }
 0x1b8   :  { %523 = vrot.lane.b32.xlu1 %v1278_v56, %s892_s7 }
 0x1ea   :  { %v630_v58 = vpop.permute.xlu1 %629 }
 0x1eb   :  { %v634_v59 = vpop.permute.xlu0 %633 }
 0x1ee   :  { %v632_v60 = vpop.permute.xlu1 %631 }
 0x1ef   :  { %v638_v61 = vsel %vm1531_vm7, %v632_v60, %v634_v59  ;;  %v639_v62 = vsel %vm1532_vm15, %v630_v58, %v632_v60  ;;  %v614_v63 = vpop.permute.xlu0 %613  ;;  %vm1536_vm7 = vcmp.le.s32.totalorder %v1041_v23, 14 }
 0x1f0   :  { %840 = vmatprep.subr.msk.mxu0 %vm1048_vm5, %v638_v61  ;;  %vm1537_vm5 = vcmp.lt.s32.totalorder %v1012_v8, 112 }
 0x1f1   :  { %841 = vmatpush1.msk.msra.mxu0 %vm1533_vm8, %v639_v62  ;;  %vm1538_vm8 = vmmov %vm1537_vm5  ;;  %v515_v62 = vld [vmem:[%s1484_s3] sm:$0xff] }
 0x1f2   :  { %v636_v3 = vpop.permute.xlu1 %635 }
 0x1f3   :  { %v637_v2 = vsel %vm1534_vm4, %v634_v59, %v636_v3  ;;  %v640_v0 = vsel %vm1535_vm3, %v636_v3, %v630_v58  ;;  %v618_v1 = vpop.permute.xlu0 %617  ;;  %vm1539_vm4 = vmmov %vm1537_vm5  ;;  %vm1541_vm3 = vcmp.lt.s32.totalorder %v1012_v8, 113 }
 0x1f4   :  { %855 = vmatprep.subr.msk.mxu1 %vm1056_vm6, %v640_v0  ;;  %vm1540_vm6 = vmmov %vm1539_vm4 }
 0x1f5   :  { %856 = vmatpush1.msk.msra.mxu1 %vm1536_vm7, %v637_v2  ;;  %vm1542_vm15 = vmmov %vm1541_vm3 }
 0x1f6   :  { %v616_v6 = vpop.permute.xlu1 %615  ;;  %vm1544_vm7 = vmmov %vm1541_vm3 }
 0x1f7   :  { %v622_v24 = vsel %vm1537_vm5, %v616_v6, %v618_v1  ;;  %v623_v10 = vsel %vm1538_vm8, %v614_v63, %v616_v6  ;;  %v598_v11 = vpop.permute.xlu0 %597  ;;  %vm1546_vm5 = vcmp.ge.s32.totalorder %v1041_v23, 1 }
 0x1f8   :  { %842 = vmatprep.subr.msk.mxu0 %vm1025_vm0, %v622_v24  ;;  %vm1543_vm0 = vcmp.ge.s32.totalorder %v1037_v22, 1 }
 0x1f9   :  { %670 = vmatpush1.msra.mxu0 %v623_v10 }
 0x1fa   :  { %v620_v13 = vpop.permute.xlu1 %619 }
 0x1fb   :  { %v621_v25 = vsel %vm1539_vm4, %v618_v1, %v620_v13  ;;  %v624_v16 = vsel %vm1540_vm6, %v620_v13, %v614_v63  ;;  %v602_v17 = vpop.permute.xlu0 %601  ;;  %vm1549_vm4 = vcmp.le.s32.totalorder %v1019_v14, 14  ;;  %vm1550_vm6 = vcmp.le.s32.totalorder %v1037_v22, 14 }
 0x1fc   :  { %857 = vmatprep.subr.msk.mxu1 %vm1030_vm2, %v624_v16  ;;  %vm1545_vm2 = vmmov %vm1541_vm3 }
 0x1fd   :  { %741 = vmatpush1.msra.mxu1 %v621_v25 }
 0x1fe   :  { %v600_v19 = vpop.permute.xlu1 %599 }
 0x1ff   :  { %v606_v20 = vsel %vm1541_vm3, %v600_v19, %v602_v17  ;;  %v607_v18 = vsel %vm1542_vm15, %v598_v11, %v600_v19  ;;  %v582_v26 = vpop.permute.xlu0 %581  ;;  %vm1553_vm15 = vcmp.le.s32.totalorder %v1021_v15, 14 }
 0x200   :  { %843 = vmatprep.subr.msk.mxu0 %vm1097_vm12, %v606_v20  ;;  %vm1547_vm12 = vcmp.lt.s32.totalorder %v1012_v8, 127 }
 0x201   :  { %844 = vmatpush1.msk.msra.mxu0 %vm1543_vm0, %v607_v18  ;;  %vm1548_vm8 = vmmov %vm1547_vm12  ;;  %vm1554_vm0 = vcmp.le.s32.totalorder %v1041_v23, 14 }
 0x202   :  { %v604_v27 = vpop.permute.xlu1 %603  ;;  %vm1552_vm3 = vmmov %vm1548_vm8 }
 0x203   :  { %v605_v21 = vsel %vm1544_vm7, %v602_v17, %v604_v27  ;;  %v608_v28 = vsel %vm1545_vm2, %v604_v27, %v598_v11  ;;  %v586_v29 = vpop.permute.xlu0 %585  ;;  %vm1555_vm7 = vcmp.lt.s32.totalorder %v1012_v8, 1  ;;  %vm1556_vm2 = vcmp.ge.s32.totalorder %v1019_v14, 1 }
 0x204   :  { %858 = vmatprep.subr.msk.mxu1 %vm1106_vm14, %v608_v28  ;;  %vm1551_vm14 = vmmov %vm1548_vm8 }
 0x205   :  { %859 = vmatpush1.msk.msra.mxu1 %vm1546_vm5, %v605_v21  ;;  %vm1557_vm5 = vmmov %vm1555_vm7 }
 0x206   :  { %v584_v30 = vpop.permute.xlu1 %583 }
 0x207   :  { %v590_v42 = vsel %vm1547_vm12, %v584_v30, %v586_v29  ;;  %v591_v31 = vsel %vm1548_vm8, %v582_v26, %v584_v30  ;;  %v566_v32 = vpop.permute.xlu0 %565  ;;  %vm1558_vm12 = vmmov %vm1557_vm5 }
 0x208   :  { %845 = vmatprep.subr.msk.mxu0 %vm1549_vm4, %v590_v42  ;;  %vm1559_vm8 = vmmov %vm1557_vm5  ;;  %vm1560_vm4 = vcmp.ge.s32.totalorder %v1037_v22, 1 }
 0x209   :  { %846 = vmatpush1.msk.msra.mxu0 %vm1550_vm6, %v591_v31  ;;  %vm1561_vm6 = vcmp.ge.s32.totalorder %v1021_v15, 1 }
 0x20a   :  { %675 = vmatprep.subr.mxu0 %v1272_v55  ;;  %v588_v43 = vpop.permute.xlu1 %587 }
 0x20b   :  { %v589_v33 = vsel %vm1551_vm14, %v586_v29, %v588_v43  ;;  %v592_v34 = vsel %vm1552_vm3, %v588_v43, %v582_v26  ;;  %v570_v36 = vpop.permute.xlu0 %569  ;;  %676 = vmatpush1.msra.mxu0 %v1264_v51  ;;  %vm1562_vm14 = vcmp.ge.s32.totalorder %v1041_v23, 1  ;;  %vm1563_vm3 = vcmp.lt.s32.totalorder %v1012_v8, 15 }
 0x20c   :  { %860 = vmatprep.subr.msk.mxu1 %vm1553_vm15, %v592_v34  ;;  %vm1564_vm15 = vcmp.le.s32.totalorder %v1019_v14, 14 }
 0x20d   :  { %861 = vmatpush1.msk.msra.mxu1 %vm1554_vm0, %v589_v33  ;;  %vm1565_vm0 = vmmov %vm1563_vm3 }
 0x20e   :  { %746 = vmatprep.subr.mxu1 %v1278_v56  ;;  %v568_v37 = vpop.permute.xlu1 %567 }
 0x20f   :  { %v575_v38 = vsel %vm1555_vm7, %v566_v32, %v568_v37  ;;  %v550_v40 = vpop.permute.xlu0 %549  ;;  %747 = vmatpush1.msra.mxu1 %v1266_v53  ;;  %v574_v47 = vsel %vm1559_vm8, %v568_v37, %v570_v36  ;;  %vm1566_vm7 = vmmov %vm1565_vm0 }
 0x210   :  { %847 = vmatprep.subr.msk.mxu0 %vm1556_vm2, %v575_v38  ;;  %vm1567_vm2 = vmmov %vm1565_vm0 }
 0x212   :  { %v572_v41 = vpop.permute.xlu1 %571 }
 0x213   :  { %v573_v44 = vsel %vm1557_vm5, %v570_v36, %v572_v41  ;;  %v576_v45 = vsel %vm1558_vm12, %v572_v41, %v566_v32  ;;  %v554_v46 = vpop.permute.xlu0 %553  ;;  %vm1568_vm5 = vcmp.le.s32.totalorder %v1021_v15, 14  ;;  %vm1569_vm12 = vcmp.lt.s32.totalorder %v1012_v8, 16 }
 0x214   :  { %848 = vmatpush1.msk.msra.mxu0 %vm1560_vm4, %v576_v45  ;;  %862 = vmatprep.subr.msk.mxu1 %vm1561_vm6, %v573_v44  ;;  %vm1570_vm8 = vmmov %vm1569_vm12  ;;  %vm1574_vm6 = vcmp.ge.s32.totalorder %v1019_v14, 1 }
 0x215   :  { %863 = vmatpush1.msk.msra.mxu1 %vm1562_vm14, %v574_v47  ;;  %vm1571_vm4 = vmmov %vm1570_vm8 }
 0x216   :  { %v552_v48 = vpop.permute.xlu1 %551 }
 0x217   :  { %v559_v49 = vsel %vm1563_vm3, %v550_v40, %v552_v48  ;;  %v534_v50 = vpop.permute.xlu0 %533  ;;  %v558_v53 = vsel %vm1567_vm2, %v552_v48, %v554_v46  ;;  %vm1578_vm3 = vcmp.ge.s32.totalorder %v1021_v15, 1 }
 0x218   :  { %849 = vmatprep.subr.msk.mxu0 %vm1564_vm15, %v559_v49  ;;  %vm1579_vm15 = vcmask 588800  }
 0x21a   :  { %v556_v51 = vpop.permute.xlu1 %555 }
 0x21b   :  { %v557_v52 = vsel %vm1565_vm0, %v554_v46, %v556_v51  ;;  %v560_v22 = vsel %vm1566_vm7, %v556_v51, %v550_v40  ;;  %v538_v23 = vpop.permute.xlu0 %537  ;;  %vm1580_vm0 = vnez %v1529_v39  ;;  %vm1581_vm7 = vmmov %vm1579_vm15 }
 0x21c   :  { %850 = vmatpush1.msk.msra.mxu0 %vm1187_vm11, %v560_v22  ;;  %864 = vmatprep.subr.msk.mxu1 %vm1568_vm5, %v557_v52  ;;  %vm1572_vm11 = vmmov %vm1571_vm4 }
 0x21d   :  { %865 = vmatpush1.msk.msra.mxu1 %vm1195_vm9, %v558_v53  ;;  %vm1573_vm9 = vcmp.lt.s32.totalorder %v1012_v8, 17 }
 0x21e   :  { %v536_v54 = vpop.permute.xlu1 %535  ;;  %vm1575_vm14 = vmmov %vm1573_vm9 }
 0x21f   :  { %v543_v55 = vsel %vm1569_vm12, %v534_v50, %v536_v54  ;;  %v542_v57 = vsel %vm1572_vm11, %v536_v54, %v538_v23  ;;  %v518_v58 = vpop.permute.xlu0 %517 }
 0x220   :  { %681 = vmatprep.subr.mxu0 %v543_v55 }
 0x222   :  { %v540_v4 = vpop.permute.xlu1 %539 }
 0x223   :  { %v544_v56 = vsel %vm1570_vm8, %v540_v4, %v534_v50  ;;  %v541_v9 = vsel %vm1571_vm4, %v538_v23, %v540_v4  ;;  %v522_v60 = vpop.permute.xlu0 %521 }
 0x224   :  { %851 = vmatpush1.msk.msra.mxu0 %vm1169_vm10, %v544_v56  ;;  %752 = vmatprep.subr.mxu1 %v541_v9  ;;  %vm1576_vm10 = vmmov %vm1573_vm9 }
 0x225   :  { %866 = vmatpush1.msk.msra.mxu1 %vm1177_vm13, %v542_v57  ;;  %vm1577_vm13 = vmmov %vm1573_vm9 }
 0x226   :  { %v520_v12 = vpop.permute.xlu1 %519 }
 0x227   :  { %v527_v59 = vsel %vm1573_vm9, %v518_v58, %v520_v12  ;;  %v526_v63 = vsel %vm1577_vm13, %v520_v12, %v522_v60 }
 0x228   :  { %852 = vmatprep.subr.msk.mxu0 %vm1574_vm6, %v527_v59 }
 0x22a   :  { %v524_v61 = vpop.permute.xlu1 %523 }
 0x22b   :  { %v525_v5 = vsel %vm1575_vm14, %v522_v60, %v524_v61  ;;  %v528_v7 = vsel %vm1576_vm10, %v524_v61, %v518_v58 }
 0x22c   :  { %853 = vmatpush1.msk.msra.mxu0 %vm1233_vm1, %v528_v7  ;;  %867 = vmatprep.subr.msk.mxu1 %vm1578_vm3, %v525_v5 }
 0x22d   :  { %854 = vmatmul.mubr.msk.f32.vlgmr.msra.gmra.mxu0 %vm1579_vm15, %v515_v62  ;;  %868 = vmatpush1.msk.msra.mxu1 %vm1580_vm0, %v526_v63 }
 0x22e   :  { %869 = vmatmul.mubr.msk.f32.vlgmr.msra.gmra.mxu1 %vm1581_vm7, %v515_v62 }
 0x230   :  { %v648_v14 = vpop.permute.xlu0 %647 }
 0x2ed   :  { %v719_v3 = vpop.f32.mrf.mxu0 }
 0x2ee   :  { %v720_v2 = vadd.f32 %v719_v3, %v648_v14  ;;  %v790_v0 = vpop.f32.mrf.mxu1 }
 0x2ef   :  { %v791_v1 = vadd.f32 %v790_v0, %v648_v14  ;;  %v721_v8 = vpop.f32.mrf.mxu0 }
 0x2f0   :  { %v795_v6 = vmax.f32 %v720_v2, 0.0  ;;  %v722_v24 = vadd.f32 %v721_v8, %v648_v14  ;;  %v792_v35 = vpop.f32.mrf.mxu1 }
 0x2f1   :  { %v797_v10 = vmax.f32 %v791_v1, 0.0  ;;  %v793_v11 = vadd.f32 %v792_v35, %v648_v14 }
 0x2f2   :  { %799 = vst [vmem:[%s1485_s5] sm:$0xff] %v795_v6  ;;  %v796_v15 = vmax.f32 %v722_v24, 0.0 }
 0x2f3   :  { %870 = vst [vmem:[%s1485_s5 + $0x10] sm:$0xff] %v797_v10  ;;  %v798_v39 = vmax.f32 %v793_v11, 0.0 }
 0x2f4   :  { %800 = vst [vmem:[%s1485_s5 + $0x8] sm:$0xff] %v796_v15 }
 0x2f5   :  { %871 = vst [vmem:[%s1485_s5 + $0x18] sm:$0xff] %v798_v39 }

</bundles_post_ra>
